<compile_context>
chip_gen: v6e
topology: v6e:2x2x1
jax: 0.10.0
libtpu: 0.0.40
codegen_flags: <defaults>
</compile_context>

<pallas_src>
import functools
import math

import jax
import jax.numpy as jnp
import numpy as np
from jax.experimental import pallas as pl
from jax.experimental.pallas import tpu as pltpu

# --- Config values relevant to the forward pass -----------------------------
STATE_DIM = 12
ACTION_DIM = 3
HIDDEN_SIZE = 256
NUM_ATOMS = 51
ATOM_PAD = 128           # per-action lane stride (atoms padded 51 -> 128)
NEG_LARGE = -1e30        # padded value-bias lanes -> ~0 probability under softmax


def _round_up(n, m):
    return ((n + m - 1) // m) * m


def qnetwork_kernel(x_ref,
                    w1_ref, b1_ref,
                    wva1_ref, bva1_ref,
                    wv2_ref, bv2_ref,
                    wa2_ref, ba2_ref,
                    out_ref,
                    *, action_dim, atom_pad, hidden, approx_recip):
    x = x_ref[...]                                          # (TB, state_dim) f32

    # Feature layer: Linear(state_dim -> H) + ReLU (bf16 GEMM, f32 accumulate).
    h = jnp.dot(x.astype(w1_ref.dtype), w1_ref[...],
                preferred_element_type=jnp.float32) + b1_ref[...]
    h = jnp.maximum(h, 0.0)                                 # (TB, H) f32

    # Fused value|advantage first hidden layer: one (H, 2H) GEMM + ReLU.
    vah = jnp.dot(h.astype(wva1_ref.dtype), wva1_ref[...],
                  preferred_element_type=jnp.float32) + bva1_ref[...]
    vah = jnp.maximum(vah, 0.0)                             # (TB, 2H) f32

    # Split (128-lane-aligned) second-layer GEMMs: no structural-zero work.
    vh = vah[:, :hidden]                                    # value hidden (TB, H)
    ah = vah[:, hidden:]                                    # adv hidden   (TB, H)
    value = jnp.dot(vh.astype(wv2_ref.dtype), wv2_ref[...],
                    preferred_element_type=jnp.float32) + bv2_ref[...]   # (TB,128)
    adv_all = jnp.dot(ah.astype(wa2_ref.dtype), wa2_ref[...],
                      preferred_element_type=jnp.float32) + ba2_ref[...] # (TB,A*128)

    # Per-action 128-aligned slices (padded lanes: value=-1e30, adv=0).
    adv = [adv_all[:, a * atom_pad:(a + 1) * atom_pad] for a in range(action_dim)]

    adv_mean = adv[0]
    for a in range(1, action_dim):
        adv_mean = adv_mean + adv[a]
    adv_mean = adv_mean * (1.0 / action_dim)

    # Per-action softmax over atoms; padded lanes contribute exactly 0.
    # Store each (TB,128) tile directly at its aligned lane offset.
    for a in range(action_dim):
        logits = value + adv[a] - adv_mean
        m = jnp.max(logits, axis=-1, keepdims=True)
        e = jnp.exp(logits - m)
        s = jnp.sum(e, axis=-1, keepdims=True)
        inv = pl.reciprocal(s, approx=approx_recip)
        out_ref[:, a * atom_pad:(a + 1) * atom_pad] = jnp.maximum(e * inv, 1e-8)


def qnetwork_forward(x, packed, *, action_dim=ACTION_DIM, num_atoms=NUM_ATOMS,
                     atom_pad=ATOM_PAD, hidden=HIDDEN_SIZE, tb=512,
                     approx_recip=False):
    """x: (B, state_dim) float32.  Returns (B, action_dim, num_atoms) float32."""
    batch, state_dim = x.shape

    if batch <= 256:
        # Tiny batch: one tile, pad rows only to the f32 sublane multiple (8).
        tb_eff = _round_up(batch, 8)
    else:
        # >= 2 grid steps (128-row aligned) so v7x's two TCs share the batch;
        # capped at `tb` rows/step to bound per-step VMEM and amortize overhead.
        tb_eff = max(128, min(_round_up(tb, 128),
                              _round_up((batch + 1) // 2, 128)))
    b_pad = _round_up(batch, tb_eff)
    if b_pad != batch:
        x = jnp.pad(x, ((0, b_pad - batch), (0, 0)))        # zero rows, dropped below

    weights = (packed["w1"], packed["b1"],
               packed["wva1"], packed["bva1"],
               packed["wv2"], packed["bv2"],
               packed["wa2"], packed["ba2"])

    def resident(arr):
        # Full-array block with a constant index map: DMA'd once, stays in VMEM
        # across all batch-grid steps.
        return pl.BlockSpec(arr.shape, lambda i: (0, 0))

    out_cols = action_dim * atom_pad
    kernel = functools.partial(qnetwork_kernel, action_dim=action_dim,
                               atom_pad=atom_pad, hidden=hidden,
                               approx_recip=approx_recip)

    out = pl.pallas_call(
        kernel,
        out_shape=jax.ShapeDtypeStruct((b_pad, out_cols), jnp.float32),
        grid=(b_pad // tb_eff,),
        in_specs=[pl.BlockSpec((tb_eff, state_dim), lambda i: (i, 0))]
                 + [resident(w) for w in weights],
        out_specs=pl.BlockSpec((tb_eff, out_cols), lambda i: (i, 0)),
        compiler_params=pltpu.CompilerParams(
            dimension_semantics=("parallel",),
            # Only raise the scoped-VMEM budget when tiles get big (v5e default
            # is 16 MiB; tb<=512 fits comfortably under every default).
            vmem_limit_bytes=(64 * 1024 * 1024 if tb_eff > 512 else None)),
    )(x, *weights)

    return out[:batch].reshape(batch, action_dim, atom_pad)[:, :, :num_atoms]


def init_params(key, state_dim=STATE_DIM, hidden=HIDDEN_SIZE,
                action_dim=ACTION_DIM, num_atoms=NUM_ATOMS):
    """Deterministic init mirroring NoisyLinear.reset_parameters (mu weights):
       uniform(-1/sqrt(in_features), 1/sqrt(in_features)).
       Weights stored transposed as (in, out)."""
    def linear(k, in_f, out_f):
        kw, kb = jax.random.split(k)
        r = 1.0 / math.sqrt(in_f)
        w = jax.random.uniform(kw, (in_f, out_f), jnp.float32, -r, r)
        b = jax.random.uniform(kb, (1, out_f), jnp.float32, -r, r)
        return w, b

    keys = jax.random.split(key, 5)
    w1, b1 = linear(keys[0], state_dim, hidden)
    wv1, bv1 = linear(keys[1], hidden, hidden)
    wv2, bv2 = linear(keys[2], hidden, num_atoms)
    wa1, ba1 = linear(keys[3], hidden, hidden)
    wa2, ba2 = linear(keys[4], hidden, action_dim * num_atoms)
    return dict(w1=w1, b1=b1, wv1=wv1, bv1=bv1, wv2=wv2, bv2=bv2,
                wa1=wa1, ba1=ba1, wa2=wa2, ba2=ba2)


def pack_params(p, *, action_dim=ACTION_DIM, num_atoms=NUM_ATOMS,
                atom_pad=ATOM_PAD, weight_dtype=jnp.bfloat16):
    """Pack raw per-layer params into the fused / lane-padded kernel layout."""
    hidden = p["w1"].shape[1]
    w1 = p["w1"].astype(weight_dtype)
    b1 = p["b1"].astype(jnp.float32)

    # Fused first hidden layer of both streams: (H, 2H).
    wva1 = jnp.concatenate([p["wv1"], p["wa1"]], axis=1).astype(weight_dtype)
    bva1 = jnp.concatenate([p["bv1"], p["ba1"]], axis=1).astype(jnp.float32)

    # Value head second layer: (H, 128). Padded lanes: weight 0, bias -1e30.
    wv2 = np.zeros((hidden, atom_pad), np.float32)
    bv2 = np.full((1, atom_pad), NEG_LARGE, np.float32)
    wv2[:, :num_atoms] = np.asarray(p["wv2"])
    bv2[:, :num_atoms] = np.asarray(p["bv2"])

    # Advantage head second layer: (H, A*128). Padded lanes: weight 0, bias 0.
    wa2 = np.zeros((hidden, action_dim * atom_pad), np.float32)
    ba2 = np.zeros((1, action_dim * atom_pad), np.float32)
    src_w = np.asarray(p["wa2"])
    src_b = np.asarray(p["ba2"])
    for a in range(action_dim):
        base = a * atom_pad
        wa2[:, base:base + num_atoms] = src_w[:, a * num_atoms:(a + 1) * num_atoms]
        ba2[:, base:base + num_atoms] = src_b[:, a * num_atoms:(a + 1) * num_atoms]

    return dict(w1=w1, b1=b1, wva1=wva1, bva1=bva1,
                wv2=jnp.asarray(wv2).astype(weight_dtype),
                bv2=jnp.asarray(bv2, dtype=jnp.float32),
                wa2=jnp.asarray(wa2).astype(weight_dtype),
                ba2=jnp.asarray(ba2, dtype=jnp.float32))


def qnetwork_reference(x, p, *, action_dim=ACTION_DIM, num_atoms=NUM_ATOMS,
                       match_bf16=True):
    """Pure-JAX reference of the PyTorch forward (eval mode). With
    match_bf16=True the GEMM inputs are rounded to bf16 (same numerics as the
    kernel's bf16 MXU path), so comparisons can be tight."""
    def mm(a, w):
        if match_bf16:
            a = a.astype(jnp.bfloat16)
            w = w.astype(jnp.bfloat16)
        return jnp.dot(a, w, preferred_element_type=jnp.float32)

    h = jax.nn.relu(mm(x, p["w1"]) + p["b1"])
    v = mm(jax.nn.relu(mm(h, p["wv1"]) + p["bv1"]), p["wv2"]) + p["bv2"]
    a = mm(jax.nn.relu(mm(h, p["wa1"]) + p["ba1"]), p["wa2"]) + p["ba2"]
    v = v.reshape(-1, 1, num_atoms)
    a = a.reshape(-1, action_dim, num_atoms)
    q_logits = v + a - a.mean(axis=1, keepdims=True)
    return jnp.maximum(jax.nn.softmax(q_logits, axis=2), 1e-8)


if __name__ == "__main__":
    key = jax.random.PRNGKey(0)
    k_params, k_x, k_x2 = jax.random.split(key, 3)

    raw_params = init_params(k_params)
    packed = pack_params(raw_params)

    # --- tiny-batch path (single 8-row tile, grid=1) -------------------------
    batch = 8
    x = jax.random.normal(k_x, (batch, STATE_DIM), jnp.float32)

    out = jax.block_until_ready(qnetwork_forward(x, packed))
    ref = jax.block_until_ready(qnetwork_reference(x, raw_params))

    assert out.shape == (batch, ACTION_DIM, NUM_ATOMS)
    np.testing.assert_allclose(np.asarray(out), np.asarray(ref),
                               rtol=5e-3, atol=1e-5)
    np.testing.assert_allclose(np.asarray(out).sum(-1), 1.0, rtol=0, atol=2e-3)

    # --- multi-tile path (grid=2, exercises batch padding/drop) ---------------
    batch2 = 300
    x2 = jax.random.normal(k_x2, (batch2, STATE_DIM), jnp.float32)
    out2 = jax.block_until_ready(qnetwork_forward(x2, packed))
    ref2 = jax.block_until_ready(qnetwork_reference(x2, raw_params))
    np.testing.assert_allclose(np.asarray(out2), np.asarray(ref2),
                               rtol=5e-3, atol=1e-5)

    print("KERNEL_OK")
</pallas_src>

<mosaic_0001>
module attributes {stable_mosaic.version = 11 : i64} {
  func.func @qnetwork_kernel(%arg0: i32, %arg1: memref<8x12xf32, #tpu.memory_space<vmem>>, %arg2: memref<12x256xbf16, #tpu.memory_space<vmem>>, %arg3: memref<1x256xf32, #tpu.memory_space<vmem>>, %arg4: memref<256x512xbf16, #tpu.memory_space<vmem>>, %arg5: memref<1x512xf32, #tpu.memory_space<vmem>>, %arg6: memref<256x128xbf16, #tpu.memory_space<vmem>>, %arg7: memref<1x128xf32, #tpu.memory_space<vmem>>, %arg8: memref<256x384xbf16, #tpu.memory_space<vmem>>, %arg9: memref<1x384xf32, #tpu.memory_space<vmem>>, %arg10: memref<8x384xf32, #tpu.memory_space<vmem>>) attributes {dimension_semantics = [#tpu.dimension_semantics<parallel>], iteration_bounds = array<i64: 1>, scalar_prefetch = 0 : i64, scratch_operands = 0 : i64, tpu.core_type = #tpu.core_type<tc>, window_params = [{transform_indices = @transform_0, window_bounds = array<i64: 8, 12>}, {pipeline_mode = #tpu.pipeline_mode<synchronous>, transform_indices = @transform_1, window_bounds = array<i64: 12, 256>}, {pipeline_mode = #tpu.pipeline_mode<synchronous>, transform_indices = @transform_2, window_bounds = array<i64: 1, 256>}, {pipeline_mode = #tpu.pipeline_mode<synchronous>, transform_indices = @transform_3, window_bounds = array<i64: 256, 512>}, {pipeline_mode = #tpu.pipeline_mode<synchronous>, transform_indices = @transform_4, window_bounds = array<i64: 1, 512>}, {pipeline_mode = #tpu.pipeline_mode<synchronous>, transform_indices = @transform_5, window_bounds = array<i64: 256, 128>}, {pipeline_mode = #tpu.pipeline_mode<synchronous>, transform_indices = @transform_6, window_bounds = array<i64: 1, 128>}, {pipeline_mode = #tpu.pipeline_mode<synchronous>, transform_indices = @transform_7, window_bounds = array<i64: 256, 384>}, {pipeline_mode = #tpu.pipeline_mode<synchronous>, transform_indices = @transform_8, window_bounds = array<i64: 1, 384>}, {transform_indices = @transform_9, window_bounds = array<i64: 8, 384>}]} {
    %c0 = arith.constant 0 : index
    %c0_0 = arith.constant 0 : index
    %0 = vector.load %arg1[%c0, %c0_0] : memref<8x12xf32, #tpu.memory_space<vmem>>, vector<8x12xf32>
    %1 = arith.truncf %0 : vector<8x12xf32> to vector<8x12xbf16>
    %c0_1 = arith.constant 0 : index
    %c0_2 = arith.constant 0 : index
    %2 = vector.load %arg2[%c0_1, %c0_2] : memref<12x256xbf16, #tpu.memory_space<vmem>>, vector<12x256xbf16>
    %cst = arith.constant dense<0.000000e+00> : vector<8x256xf32>
    %3 = tpu.matmul %1, %2, %cst {dimension_numbers = #tpu.dot_dimension_numbers<[1], [0], [0], [1], [0, 0, 1, 1], [], []>} : vector<8x12xbf16>, vector<12x256xbf16>, vector<8x256xf32> -> vector<8x256xf32>
    %c0_3 = arith.constant 0 : index
    %c0_4 = arith.constant 0 : index
    %4 = vector.load %arg3[%c0_3, %c0_4] : memref<1x256xf32, #tpu.memory_space<vmem>>, vector<1x256xf32>
    %5 = vector.broadcast %4 : vector<1x256xf32> to vector<8x256xf32>
    %6 = arith.addf %3, %5 : vector<8x256xf32>
    %cst_5 = arith.constant 0.000000e+00 : f32
    %7 = vector.broadcast %cst_5 : f32 to vector<8x256xf32>
    %8 = arith.maximumf %6, %7 : vector<8x256xf32>
    %9 = arith.truncf %8 : vector<8x256xf32> to vector<8x256xbf16>
    %c0_6 = arith.constant 0 : index
    %c0_7 = arith.constant 0 : index
    %10 = vector.load %arg4[%c0_6, %c0_7] : memref<256x512xbf16, #tpu.memory_space<vmem>>, vector<256x512xbf16>
    %cst_8 = arith.constant dense<0.000000e+00> : vector<8x512xf32>
    %11 = tpu.matmul %9, %10, %cst_8 {dimension_numbers = #tpu.dot_dimension_numbers<[1], [0], [0], [1], [0, 0, 1, 1], [], []>} : vector<8x256xbf16>, vector<256x512xbf16>, vector<8x512xf32> -> vector<8x512xf32>
    %c0_9 = arith.constant 0 : index
    %c0_10 = arith.constant 0 : index
    %12 = vector.load %arg5[%c0_9, %c0_10] : memref<1x512xf32, #tpu.memory_space<vmem>>, vector<1x512xf32>
    %13 = vector.broadcast %12 : vector<1x512xf32> to vector<8x512xf32>
    %14 = arith.addf %11, %13 : vector<8x512xf32>
    %cst_11 = arith.constant 0.000000e+00 : f32
    %15 = vector.broadcast %cst_11 : f32 to vector<8x512xf32>
    %16 = arith.maximumf %14, %15 : vector<8x512xf32>
    %17 = vector.extract_strided_slice %16 {offsets = [0, 0], sizes = [8, 256], strides = [1, 1]} : vector<8x512xf32> to vector<8x256xf32>
    %18 = vector.extract_strided_slice %16 {offsets = [0, 256], sizes = [8, 256], strides = [1, 1]} : vector<8x512xf32> to vector<8x256xf32>
    %19 = arith.truncf %17 : vector<8x256xf32> to vector<8x256xbf16>
    %c0_12 = arith.constant 0 : index
    %c0_13 = arith.constant 0 : index
    %20 = vector.load %arg6[%c0_12, %c0_13] : memref<256x128xbf16, #tpu.memory_space<vmem>>, vector<256x128xbf16>
    %cst_14 = arith.constant dense<0.000000e+00> : vector<8x128xf32>
    %21 = tpu.matmul %19, %20, %cst_14 {dimension_numbers = #tpu.dot_dimension_numbers<[1], [0], [0], [1], [0, 0, 1, 1], [], []>} : vector<8x256xbf16>, vector<256x128xbf16>, vector<8x128xf32> -> vector<8x128xf32>
    %c0_15 = arith.constant 0 : index
    %c0_16 = arith.constant 0 : index
    %22 = vector.load %arg7[%c0_15, %c0_16] : memref<1x128xf32, #tpu.memory_space<vmem>>, vector<1x128xf32>
    %23 = vector.broadcast %22 : vector<1x128xf32> to vector<8x128xf32>
    %24 = arith.addf %21, %23 : vector<8x128xf32>
    %25 = arith.truncf %18 : vector<8x256xf32> to vector<8x256xbf16>
    %c0_17 = arith.constant 0 : index
    %c0_18 = arith.constant 0 : index
    %26 = vector.load %arg8[%c0_17, %c0_18] : memref<256x384xbf16, #tpu.memory_space<vmem>>, vector<256x384xbf16>
    %cst_19 = arith.constant dense<0.000000e+00> : vector<8x384xf32>
    %27 = tpu.matmul %25, %26, %cst_19 {dimension_numbers = #tpu.dot_dimension_numbers<[1], [0], [0], [1], [0, 0, 1, 1], [], []>} : vector<8x256xbf16>, vector<256x384xbf16>, vector<8x384xf32> -> vector<8x384xf32>
    %c0_20 = arith.constant 0 : index
    %c0_21 = arith.constant 0 : index
    %28 = vector.load %arg9[%c0_20, %c0_21] : memref<1x384xf32, #tpu.memory_space<vmem>>, vector<1x384xf32>
    %29 = vector.broadcast %28 : vector<1x384xf32> to vector<8x384xf32>
    %30 = arith.addf %27, %29 : vector<8x384xf32>
    %31 = vector.extract_strided_slice %30 {offsets = [0, 0], sizes = [8, 128], strides = [1, 1]} : vector<8x384xf32> to vector<8x128xf32>
    %32 = vector.extract_strided_slice %30 {offsets = [0, 128], sizes = [8, 128], strides = [1, 1]} : vector<8x384xf32> to vector<8x128xf32>
    %33 = vector.extract_strided_slice %30 {offsets = [0, 256], sizes = [8, 128], strides = [1, 1]} : vector<8x384xf32> to vector<8x128xf32>
    %34 = arith.addf %31, %32 : vector<8x128xf32>
    %35 = arith.addf %34, %33 : vector<8x128xf32>
    %cst_22 = arith.constant 0.333333343 : f32
    %36 = vector.broadcast %cst_22 : f32 to vector<8x128xf32>
    %37 = arith.mulf %35, %36 : vector<8x128xf32>
    %38 = arith.addf %24, %31 : vector<8x128xf32>
    %39 = arith.subf %38, %37 : vector<8x128xf32>
    %cst_23 = arith.constant dense<0xFF800000> : vector<8xf32>
    %40 = vector.multi_reduction <maximumf>, %39, %cst_23 [1] : vector<8x128xf32> to vector<8xf32>
    %41 = vector.shape_cast %40 : vector<8xf32> to vector<8x1xf32>
    %42 = vector.broadcast %41 : vector<8x1xf32> to vector<8x128xf32>
    %43 = arith.subf %39, %42 : vector<8x128xf32>
    %44 = math.exp %43 : vector<8x128xf32>
    %cst_24 = arith.constant dense<0.000000e+00> : vector<8xf32>
    %45 = vector.multi_reduction <add>, %44, %cst_24 [1] : vector<8x128xf32> to vector<8xf32>
    %46 = vector.shape_cast %45 : vector<8xf32> to vector<8x1xf32>
    %47 = tpu.reciprocal %46 : vector<8x1xf32> -> vector<8x1xf32>
    %48 = vector.broadcast %47 : vector<8x1xf32> to vector<8x128xf32>
    %49 = arith.mulf %44, %48 : vector<8x128xf32>
    %cst_25 = arith.constant 9.99999993E-9 : f32
    %50 = vector.broadcast %cst_25 : f32 to vector<8x128xf32>
    %51 = arith.maximumf %49, %50 : vector<8x128xf32>
    %c0_26 = arith.constant 0 : index
    %c0_27 = arith.constant 0 : index
    %52 = vector.load %arg10[%c0_26, %c0_27] : memref<8x384xf32, #tpu.memory_space<vmem>>, vector<8x128xf32>
    tpu.vector_store %arg10[%c0_26, %c0_27], %51 {strides = array<i32>} : memref<8x384xf32, #tpu.memory_space<vmem>>, vector<8x128xf32>,
    %53 = arith.addf %24, %32 : vector<8x128xf32>
    %54 = arith.subf %53, %37 : vector<8x128xf32>
    %cst_28 = arith.constant dense<0xFF800000> : vector<8xf32>
    %55 = vector.multi_reduction <maximumf>, %54, %cst_28 [1] : vector<8x128xf32> to vector<8xf32>
    %56 = vector.shape_cast %55 : vector<8xf32> to vector<8x1xf32>
    %57 = vector.broadcast %56 : vector<8x1xf32> to vector<8x128xf32>
    %58 = arith.subf %54, %57 : vector<8x128xf32>
    %59 = math.exp %58 : vector<8x128xf32>
    %cst_29 = arith.constant dense<0.000000e+00> : vector<8xf32>
    %60 = vector.multi_reduction <add>, %59, %cst_29 [1] : vector<8x128xf32> to vector<8xf32>
    %61 = vector.shape_cast %60 : vector<8xf32> to vector<8x1xf32>
    %62 = tpu.reciprocal %61 : vector<8x1xf32> -> vector<8x1xf32>
    %63 = vector.broadcast %62 : vector<8x1xf32> to vector<8x128xf32>
    %64 = arith.mulf %59, %63 : vector<8x128xf32>
    %cst_30 = arith.constant 9.99999993E-9 : f32
    %65 = vector.broadcast %cst_30 : f32 to vector<8x128xf32>
    %66 = arith.maximumf %64, %65 : vector<8x128xf32>
    %c0_31 = arith.constant 0 : index
    %c128 = arith.constant 128 : index
    %67 = vector.load %arg10[%c0_31, %c128] : memref<8x384xf32, #tpu.memory_space<vmem>>, vector<8x128xf32>
    tpu.vector_store %arg10[%c0_31, %c128], %66 {strides = array<i32>} : memref<8x384xf32, #tpu.memory_space<vmem>>, vector<8x128xf32>,
    %68 = arith.addf %24, %33 : vector<8x128xf32>
    %69 = arith.subf %68, %37 : vector<8x128xf32>
    %cst_32 = arith.constant dense<0xFF800000> : vector<8xf32>
    %70 = vector.multi_reduction <maximumf>, %69, %cst_32 [1] : vector<8x128xf32> to vector<8xf32>
    %71 = vector.shape_cast %70 : vector<8xf32> to vector<8x1xf32>
    %72 = vector.broadcast %71 : vector<8x1xf32> to vector<8x128xf32>
    %73 = arith.subf %69, %72 : vector<8x128xf32>
    %74 = math.exp %73 : vector<8x128xf32>
    %cst_33 = arith.constant dense<0.000000e+00> : vector<8xf32>
    %75 = vector.multi_reduction <add>, %74, %cst_33 [1] : vector<8x128xf32> to vector<8xf32>
    %76 = vector.shape_cast %75 : vector<8xf32> to vector<8x1xf32>
    %77 = tpu.reciprocal %76 : vector<8x1xf32> -> vector<8x1xf32>
    %78 = vector.broadcast %77 : vector<8x1xf32> to vector<8x128xf32>
    %79 = arith.mulf %74, %78 : vector<8x128xf32>
    %cst_34 = arith.constant 9.99999993E-9 : f32
    %80 = vector.broadcast %cst_34 : f32 to vector<8x128xf32>
    %81 = arith.maximumf %79, %80 : vector<8x128xf32>
    %c0_35 = arith.constant 0 : index
    %c256 = arith.constant 256 : index
    %82 = vector.load %arg10[%c0_35, %c256] : memref<8x384xf32, #tpu.memory_space<vmem>>, vector<8x128xf32>
    tpu.vector_store %arg10[%c0_35, %c256], %81 {strides = array<i32>} : memref<8x384xf32, #tpu.memory_space<vmem>>, vector<8x128xf32>,
    return
  }
  func.func @transform_0(%arg0: i32) -> (i32, i32) {
    %c0_i32 = arith.constant 0 : i32
    %c0_i32_0 = arith.constant 0 : i32
    return %arg0, %c0_i32 : i32, i32
  }
  func.func @transform_1(%arg0: i32) -> (i32, i32) {
    %c0_i32 = arith.constant 0 : i32
    %c0_i32_0 = arith.constant 0 : i32
    %c0_i32_1 = arith.constant 0 : i32
    return %c0_i32, %c0_i32_0 : i32, i32
  }
  func.func @transform_2(%arg0: i32) -> (i32, i32) {
    %c0_i32 = arith.constant 0 : i32
    %c0_i32_0 = arith.constant 0 : i32
    %c0_i32_1 = arith.constant 0 : i32
    return %c0_i32, %c0_i32_0 : i32, i32
  }
  func.func @transform_3(%arg0: i32) -> (i32, i32) {
    %c0_i32 = arith.constant 0 : i32
    %c0_i32_0 = arith.constant 0 : i32
    %c0_i32_1 = arith.constant 0 : i32
    return %c0_i32, %c0_i32_0 : i32, i32
  }
  func.func @transform_4(%arg0: i32) -> (i32, i32) {
    %c0_i32 = arith.constant 0 : i32
    %c0_i32_0 = arith.constant 0 : i32
    %c0_i32_1 = arith.constant 0 : i32
    return %c0_i32, %c0_i32_0 : i32, i32
  }
  func.func @transform_5(%arg0: i32) -> (i32, i32) {
    %c0_i32 = arith.constant 0 : i32
    %c0_i32_0 = arith.constant 0 : i32
    %c0_i32_1 = arith.constant 0 : i32
    return %c0_i32, %c0_i32_0 : i32, i32
  }
  func.func @transform_6(%arg0: i32) -> (i32, i32) {
    %c0_i32 = arith.constant 0 : i32
    %c0_i32_0 = arith.constant 0 : i32
    %c0_i32_1 = arith.constant 0 : i32
    return %c0_i32, %c0_i32_0 : i32, i32
  }
  func.func @transform_7(%arg0: i32) -> (i32, i32) {
    %c0_i32 = arith.constant 0 : i32
    %c0_i32_0 = arith.constant 0 : i32
    %c0_i32_1 = arith.constant 0 : i32
    return %c0_i32, %c0_i32_0 : i32, i32
  }
  func.func @transform_8(%arg0: i32) -> (i32, i32) {
    %c0_i32 = arith.constant 0 : i32
    %c0_i32_0 = arith.constant 0 : i32
    %c0_i32_1 = arith.constant 0 : i32
    return %c0_i32, %c0_i32_0 : i32, i32
  }
  func.func @transform_9(%arg0: i32) -> (i32, i32) {
    %c0_i32 = arith.constant 0 : i32
    %c0_i32_0 = arith.constant 0 : i32
    return %arg0, %c0_i32 : i32, i32
  }
}

</mosaic_0001>

<bundles_post_ra>
// kernel: tpu_custom_call.1
= control target key start
LH: loop header
LB: loop body
LE: loop exit
PB: predicated region body
PF: predicated region fallthrough
CT: control target
= control target key end

     0   :  { %14 = vsyncpa [#allocation3], 0  ;;  %s1991_s0 = inlined_call_operand.hbm [shape: f32[8,12], index: 0, kind: input, shape index: {}]   ;;  %s1992_s1 = inlined_call_operand.hbm [shape: bf16[12,256], index: 1, kind: input, shape index: {}]   ;;  %s1993_s2 = inlined_call_operand.hbm [shape: f32[1,256], index: 2, kind: input, shape index: {}]   ;;  %s1994_s3 = inlined_call_operand.hbm [shape: bf16[256,512], index: 3, kind: input, shape index: {}]   ;;  %s1995_s4 = inlined_call_operand.vmem [shape: f32[1,512], index: 4, kind: input, shape index: {}]   ;;  %s1996_s5 = inlined_call_operand.hbm [shape: bf16[256,128], index: 5, kind: input, shape index: {}]   ;;  %s1997_s6 = inlined_call_operand.vmem [shape: f32[1,128], index: 6, kind: input, shape index: {}]   ;;  %s1998_s7 = inlined_call_operand.hbm [shape: bf16[256,384], index: 7, kind: input, shape index: {}]   ;;  %s1999_s8 = inlined_call_operand.vmem [shape: f32[1,384], index: 8, kind: input, shape index: {}]   ;;  %s2000_s9 = inlined_call_operand.hbm [shape: f32[8,384], index: 9, kind: output, shape index: {}]  }
   0x1   :  { %15 = vsyncpa [#allocation6], 0 }
   0x2   :  { %16 = vsyncpa [#allocation9], 0 }
   0x3   :  { %17 = vsyncpa [#allocation12], 0 }
   0x4   :  { %18 = vsyncpa [#allocation4], 0  ;;  %s1875_s30 = smov [#allocation5]  }
   0x5   :  { %s34_s10 = sshll.u32 %s1875_s30, 4  ;;  %s35_s10 = int_to_ptr.vmem [resolvable:$true] %s34_s10 }
   0x6   :  { %s1733_s11 = scalar_lea.vmem %s35_s10, 256  ;;  %p1738_p1 = scmp.lt.s32.totalorder %s35_s10, %s35_s10 }
   0x7   :  { %p1734_p0 = scmp.ne.s32.totalorder %s35_s10, %s1733_s11  ;;  %p1739_p2 = scmp.lt.s32.totalorder %s1733_s11, %s1733_s11 }
   0x9   :  { %p1740_p3 = por %p1739_p2, %p1738_p1 }
   0xb   :  { %p1741_p4 = pnand %p1740_p3, %p1734_p0 }
   0xd   :  { %1744 = shalt.err (!%p1741_p4)
}
   0xe   :  { %s1876_s12 = smov 128   ;;  %s1877_s13 = smov 8  }
   0xf   :  { %40 = dma.hbm_to_vmem [thread:$0]  %s1992_s1, 256, %s35_s10, [#allocation6], %s1876_s12, %s1876_s12, %s1877_s13  }
  0x10   :  { %s1878_s16 = smov [#allocation8]  }
  0x11   :  { %s56_s17 = sshll.u32 %s1878_s16, 4  ;;  %s57_s17 = int_to_ptr.vmem [resolvable:$true] %s56_s17 }
  0x12   :  { %s1753_s18 = scalar_lea.vmem %s57_s17, 8192  ;;  %p1758_p6 = scmp.lt.s32.totalorder %s57_s17, %s57_s17 }
  0x13   :  { %p1754_p5 = scmp.ne.s32.totalorder %s57_s17, %s1753_s18  ;;  %p1759_p7 = scmp.lt.s32.totalorder %s1753_s18, %s1753_s18 }
  0x15   :  { %p1760_p8 = por %p1759_p7, %p1758_p6 }
  0x17   :  { %p1761_p9 = pnand %p1760_p8, %p1754_p5 }
  0x19   :  { %1764 = shalt.err (!%p1761_p9)
}
  0x1a   :  { %s1879_s19 = smov 256   ;;  %s1880_s20 = smov 16  }
  0x1b   :  { %62 = dma.hbm_to_vmem [thread:$0]  %s1994_s3, 8192, %s57_s17, [#allocation9], %s1879_s19, %s1879_s19, %s1880_s20  }
  0x1c   :  { %s1881_s23 = smov [#allocation2]   ;;  %s1882_s25 = smov [#allocation7]  }
  0x1d   :  { %s25_s24 = sshll.u32 %s1881_s23, 4  ;;  %s47_s1 = sshll.u32 %s1882_s25, 4  ;;  %s26_s24 = int_to_ptr.vmem [resolvable:$true] %s25_s24  ;;  %s48_s1 = int_to_ptr.vmem [resolvable:$true] %s47_s1 }
  0x1e   :  { %s1773_s26 = scalar_lea.vmem %s26_s24, 128  ;;  %p1778_p11 = scmp.lt.s32.totalorder %s26_s24, %s26_s24 }
  0x1f   :  { %p1774_p10 = scmp.ne.s32.totalorder %s26_s24, %s1773_s26  ;;  %p1779_p12 = scmp.lt.s32.totalorder %s1773_s26, %s1773_s26 }
  0x21   :  { %p1780_p13 = por %p1779_p12, %p1778_p11 }
  0x23   :  { %p1781_p0 = pnand %p1780_p13, %p1774_p10 }
  0x25   :  { %1784 = shalt.err (!%p1781_p0)
}
  0x26   :  { %28 = dma.hbm_to_vmem [thread:$0]  %s1991_s0, 128, %s26_s24, [#allocation3]  }
  0x27   :  { %s1793_s29 = scalar_lea.vmem %s48_s1, 32  ;;  %p1798_p2 = scmp.lt.s32.totalorder %s48_s1, %s48_s1 }
  0x28   :  { %p1794_p1 = scmp.ne.s32.totalorder %s48_s1, %s1793_s29  ;;  %p1799_p3 = scmp.lt.s32.totalorder %s1793_s29, %s1793_s29 }
  0x2a   :  { %p1800_p4 = por %p1799_p3, %p1798_p2 }
  0x2c   :  { %p1801_p5 = pnand %p1800_p4, %p1794_p1 }
  0x2e   :  { %1804 = shalt.err (!%p1801_p5)
}
  0x2f   :  { %50 = dma.hbm_to_vmem [thread:$0]  %s1993_s2, 32, %s48_s1, [#allocation6]  }
  0x30   :  { %s1883_s10 = smov [#allocation10]  }
  0x31   :  { %s70_s11 = sshll.u32 %s1883_s10, 4  ;;  %s71_s11 = int_to_ptr.vmem [resolvable:$true] %s70_s11 }
  0x32   :  { %s1813_s12 = scalar_lea.vmem %s71_s11, 2048  ;;  %p1818_p7 = scmp.lt.s32.totalorder %s71_s11, %s71_s11 }
  0x33   :  { %p1814_p6 = scmp.ne.s32.totalorder %s71_s11, %s1813_s12  ;;  %p1819_p8 = scmp.lt.s32.totalorder %s1813_s12, %s1813_s12 }
  0x35   :  { %p1820_p9 = por %p1819_p8, %p1818_p7 }
  0x37   :  { %p1821_p10 = pnand %p1820_p9, %p1814_p6 }
  0x39   :  { %1824 = shalt.err (!%p1821_p10)
}
  0x3a   :  { %s1884_s0 = smov 64   ;;  %s1885_s13 = smov 4  }
  0x3b   :  { %76 = dma.hbm_to_vmem [thread:$0]  %s1996_s5, 2048, %s71_s11, [#allocation9], %s1884_s0, %s1884_s0, %s1885_s13  }
  0x3c   :  { %s1886_s16 = smov [#allocation11]  }
  0x3d   :  { %s84_s17 = sshll.u32 %s1886_s16, 4  ;;  %s85_s17 = int_to_ptr.vmem [resolvable:$true] %s84_s17 }
  0x3e   :  { %s1833_s2 = scalar_lea.vmem %s85_s17, 6144  ;;  %p1838_p12 = scmp.lt.s32.totalorder %s85_s17, %s85_s17 }
  0x3f   :  { %p1834_p11 = scmp.ne.s32.totalorder %s85_s17, %s1833_s2  ;;  %p1839_p13 = scmp.lt.s32.totalorder %s1833_s2, %s1833_s2 }
  0x41   :  { %p1840_p0 = por %p1839_p13, %p1838_p12 }
  0x43   :  { %p1841_p1 = pnand %p1840_p0, %p1834_p11 }
  0x45   :  { %1844 = shalt.err (!%p1841_p1)
}
  0x46   :  { %s1887_s18 = smov 192   ;;  %s1888_s19 = smov 12  }
  0x47   :  { %90 = dma.hbm_to_vmem [thread:$0]  %s1998_s7, 6144, %s85_s17, [#allocation12], %s1887_s18, %s1887_s18, %s1888_s19  }
  0x48   :  { %1865 = dma.done.wait [#allocation3], 128  }
  0x49   :  { %1866 = vsyncadd [#allocation3], 4294967168 }
  0x4a   :  { %1867 = dma.done.wait [#allocation6], 288  }
  0x4b   :  { %1868 = vsyncadd [#allocation6], 4294967008 }
  0x4c   :  { %1869 = dma.done.wait [#allocation9], 10240  }
  0x4d   :  { %1870 = vsyncadd [#allocation9], 4294957056 }
  0x4e   :  { %1871 = dma.done.wait [#allocation12], 6144  }
  0x4f   :  { %1872 = vsyncadd [#allocation12], 4294961152  ;;  %v1889_v0 = vmov 0   ;;  %vm140_vm0 = vcmask 1045504   ;;  %v112_v3 = vld [vmem:[#allocation2] sm:$0xff]  ;;  %vm136_vm1 = vcmask 97280  }
  0x50   :  { %179 = vmatprep.mubr.bf16.mxu0 %v1889_v0  ;;  %v1534_v1 = vld [vmem:[#allocation5 + $0x4] ss:$8 sps:$4 sm:$0x3f]   ;;  %v1536_v2 = vld [vmem:[#allocation5] ss:$8 sps:$4 sm:$0x3f]   ;;  %v113_v6 = vpack.c.bf16 %v112_v3, %v112_v3 }
  0x51   :  { %1343 = vmatprep.subr.msk.bf16.mxu0 %vm140_vm0, %v1534_v1  ;;  %v1537_v4 = vld [vmem:[#allocation8 + $0xe4] ss:$16 sps:$4 sm:$0xff]   ;;  %v142_v5 = vsel %vm140_vm0, %v1536_v2, 0  ;;  %v1539_v7 = vld [vmem:[#allocation8 + $0xe8] ss:$16 sps:$4 sm:$0xff]  }
  0x52   :  { %v1541_v8 = vld [vmem:[#allocation8 + $0xec] ss:$16 sps:$4 sm:$0xff]   ;;  %162 = vmatpush1.bf16.msra.mxu0 %v142_v5  ;;  %598 = vmatprep.subr.bf16.mxu1 %v1537_v4  ;;  %v1542_v9 = vld [vmem:[#allocation8 + $0xe0] ss:$16 sps:$4 sm:$0xff]   ;;  %v1543_v10 = vld [vmem:[#allocation8 + $0xc4] ss:$16 sps:$4 sm:$0xff]  }
  0x53   :  { %639 = vmatprep.subr.bf16.mxu0 %v1541_v8  ;;  %599 = vmatpush1.bf16.msra.mxu1 %v1542_v9  ;;  %v1547_v11 = vld [vmem:[#allocation8 + $0xcc] ss:$16 sps:$4 sm:$0xff]   ;;  %v1548_v12 = vld [vmem:[#allocation8 + $0xc0] ss:$16 sps:$4 sm:$0xff]   ;;  %v1549_v13 = vld [vmem:[#allocation8 + $0xa4] ss:$16 sps:$4 sm:$0xff]   ;;  %v118_v8 = vlaneseq }
  0x54   :  { %600 = vmatprep.subr.bf16.mxu1 %v1543_v10  ;;  %v1545_v14 = vld [vmem:[#allocation8 + $0xc8] ss:$16 sps:$4 sm:$0xff]   ;;  %v1553_v15 = vld [vmem:[#allocation8 + $0xac] ss:$16 sps:$4 sm:$0xff]   ;;  %v1554_v16 = vld [vmem:[#allocation8 + $0xa0] ss:$16 sps:$4 sm:$0xff]  }
  0x55   :  { %1344 = vmatmul.mubr.msk.bf16.vlgmr.msra.gmra.mxu0 %vm136_vm1, %v113_v6  ;;  %v1555_v17 = vld [vmem:[#allocation8 + $0x84] ss:$16 sps:$4 sm:$0xff]   ;;  %v1551_v18 = vld [vmem:[#allocation8 + $0xa8] ss:$16 sps:$4 sm:$0xff]   ;;  %v1559_v19 = vld [vmem:[#allocation8 + $0x8c] ss:$16 sps:$4 sm:$0xff]  }
  0x56   :  { %640 = vmatpush1.bf16.msra.mxu0 %v1539_v7  ;;  %v1560_v20 = vld [vmem:[#allocation8 + $0x80] ss:$16 sps:$4 sm:$0xff]   ;;  %v1561_v21 = vld [vmem:[#allocation8 + $0x64] ss:$16 sps:$4 sm:$0xff]   ;;  %v1557_v22 = vld [vmem:[#allocation8 + $0x88] ss:$16 sps:$4 sm:$0xff]  }
  0x57   :  { %641 = vmatprep.subr.bf16.mxu0 %v1547_v11  ;;  %601 = vmatpush1.bf16.msra.mxu1 %v1548_v12  ;;  %v1565_v23 = vld [vmem:[#allocation8 + $0x6c] ss:$16 sps:$4 sm:$0xff]   ;;  %v1566_v24 = vld [vmem:[#allocation8 + $0x60] ss:$16 sps:$4 sm:$0xff]   ;;  %v1567_v25 = vld [vmem:[#allocation8 + $0x44] ss:$16 sps:$4 sm:$0xff]  }
  0x58   :  { %602 = vmatprep.subr.bf16.mxu1 %v1549_v13  ;;  %v1563_v26 = vld [vmem:[#allocation8 + $0x68] ss:$16 sps:$4 sm:$0xff]   ;;  %v1571_v27 = vld [vmem:[#allocation8 + $0x4c] ss:$16 sps:$4 sm:$0xff]   ;;  %v1572_v28 = vld [vmem:[#allocation8 + $0x40] ss:$16 sps:$4 sm:$0xff]  }
  0x59   :  { %v1573_v29 = vld [vmem:[#allocation8 + $0x24] ss:$16 sps:$4 sm:$0xff]   ;;  %v1569_v30 = vld [vmem:[#allocation8 + $0x48] ss:$16 sps:$4 sm:$0xff]   ;;  %v1577_v31 = vld [vmem:[#allocation8 + $0x2c] ss:$16 sps:$4 sm:$0xff]  }
  0x5a   :  { %642 = vmatpush1.bf16.msra.mxu0 %v1545_v14  ;;  %v1578_v32 = vld [vmem:[#allocation8 + $0x20] ss:$16 sps:$4 sm:$0xff]   ;;  %v1579_v33 = vld [vmem:[#allocation8 + $0x4] ss:$16 sps:$4 sm:$0xff]   ;;  %v1575_v34 = vld [vmem:[#allocation8 + $0x28] ss:$16 sps:$4 sm:$0xff]  }
  0x5b   :  { %643 = vmatprep.subr.bf16.mxu0 %v1553_v15  ;;  %603 = vmatpush1.bf16.msra.mxu1 %v1554_v16  ;;  %v1583_v35 = vld [vmem:[#allocation8 + $0xc] ss:$16 sps:$4 sm:$0xff]   ;;  %v1584_v36 = vld [vmem:[#allocation8] ss:$16 sps:$4 sm:$0xff]   ;;  %v1585_v37 = vld [vmem:[#allocation8 + $0x1e4] ss:$16 sps:$4 sm:$0xff]  }
  0x5c   :  { %604 = vmatprep.subr.bf16.mxu1 %v1555_v17  ;;  %v1581_v38 = vld [vmem:[#allocation8 + $0x8] ss:$16 sps:$4 sm:$0xff]   ;;  %v1589_v39 = vld [vmem:[#allocation8 + $0x1ec] ss:$16 sps:$4 sm:$0xff]   ;;  %v1590_v40 = vld [vmem:[#allocation8 + $0x1e0] ss:$16 sps:$4 sm:$0xff]  }
  0x5d   :  { %v1591_v41 = vld [vmem:[#allocation8 + $0x1c4] ss:$16 sps:$4 sm:$0xff]   ;;  %v1587_v42 = vld [vmem:[#allocation8 + $0x1e8] ss:$16 sps:$4 sm:$0xff]   ;;  %v1595_v43 = vld [vmem:[#allocation8 + $0x1cc] ss:$16 sps:$4 sm:$0xff]  }
  0x5e   :  { %644 = vmatpush1.bf16.msra.mxu0 %v1551_v18  ;;  %v1593_v44 = vld [vmem:[#allocation8 + $0x1c8] ss:$16 sps:$4 sm:$0xff]   ;;  %v1596_v45 = vld [vmem:[#allocation8 + $0x1c0] ss:$16 sps:$4 sm:$0xff]   ;;  %v1597_v46 = vld [vmem:[#allocation8 + $0x1a4] ss:$16 sps:$4 sm:$0xff]  }
  0x5f   :  { %645 = vmatprep.subr.bf16.mxu0 %v1559_v19  ;;  %605 = vmatpush1.bf16.msra.mxu1 %v1560_v20  ;;  %v1601_v47 = vld [vmem:[#allocation8 + $0x1ac] ss:$16 sps:$4 sm:$0xff]   ;;  %v1602_v48 = vld [vmem:[#allocation8 + $0x1a0] ss:$16 sps:$4 sm:$0xff]   ;;  %v1603_v49 = vld [vmem:[#allocation8 + $0x184] ss:$16 sps:$4 sm:$0xff]  }
  0x60   :  { %606 = vmatprep.subr.bf16.mxu1 %v1561_v21  ;;  %v1599_v50 = vld [vmem:[#allocation8 + $0x1a8] ss:$16 sps:$4 sm:$0xff]   ;;  %v1607_v51 = vld [vmem:[#allocation8 + $0x18c] ss:$16 sps:$4 sm:$0xff]   ;;  %v1608_v52 = vld [vmem:[#allocation8 + $0x180] ss:$16 sps:$4 sm:$0xff]  }
  0x61   :  { %v1609_v53 = vld [vmem:[#allocation8 + $0x164] ss:$16 sps:$4 sm:$0xff]   ;;  %v1605_v54 = vld [vmem:[#allocation8 + $0x188] ss:$16 sps:$4 sm:$0xff]   ;;  %v1613_v55 = vld [vmem:[#allocation8 + $0x16c] ss:$16 sps:$4 sm:$0xff]  }
  0x62   :  { %646 = vmatpush1.bf16.msra.mxu0 %v1557_v22  ;;  %v1614_v56 = vld [vmem:[#allocation8 + $0x160] ss:$16 sps:$4 sm:$0xff]   ;;  %v1615_v57 = vld [vmem:[#allocation8 + $0x144] ss:$16 sps:$4 sm:$0xff]   ;;  %v1611_v58 = vld [vmem:[#allocation8 + $0x168] ss:$16 sps:$4 sm:$0xff]  }
  0x63   :  { %647 = vmatprep.subr.bf16.mxu0 %v1565_v23  ;;  %607 = vmatpush1.bf16.msra.mxu1 %v1566_v24  ;;  %v1619_v59 = vld [vmem:[#allocation8 + $0x14c] ss:$16 sps:$4 sm:$0xff]   ;;  %v1620_v60 = vld [vmem:[#allocation8 + $0x140] ss:$16 sps:$4 sm:$0xff]   ;;  %v1617_v61 = vld [vmem:[#allocation8 + $0x148] ss:$16 sps:$4 sm:$0xff]  }
  0x64   :  { %608 = vmatprep.subr.bf16.mxu1 %v1567_v25  ;;  %v1621_v62 = vld [vmem:[#allocation8 + $0x124] ss:$16 sps:$4 sm:$0xff]   ;;  %v1625_v63 = vld [vmem:[#allocation8 + $0x12c] ss:$16 sps:$4 sm:$0xff]   ;;  %v1623_v0 = vld [vmem:[#allocation8 + $0x128] ss:$16 sps:$4 sm:$0xff]  }
  0x65   :  { %v1626_v1 = vld [vmem:[#allocation8 + $0x120] ss:$16 sps:$4 sm:$0xff]   ;;  %v1627_v2 = vld [vmem:[#allocation8 + $0x104] ss:$16 sps:$4 sm:$0xff]   ;;  %v1631_v3 = vld [vmem:[#allocation8 + $0x10c] ss:$16 sps:$4 sm:$0xff]  }
  0x66   :  { %648 = vmatpush1.bf16.msra.mxu0 %v1563_v26  ;;  %v1629_v4 = vld [vmem:[#allocation8 + $0x108] ss:$16 sps:$4 sm:$0xff]   ;;  %v1632_v5 = vld [vmem:[#allocation8 + $0x100] ss:$16 sps:$4 sm:$0xff]   ;;  %v1959_v9 = vshrl.u32 %v118_v8, 7 }
  0x67   :  { %649 = vmatprep.subr.bf16.mxu0 %v1571_v27  ;;  %609 = vmatpush1.bf16.msra.mxu1 %v1572_v28  ;;  %v1635_v6 = vld [vmem:[#allocation11 + $0xac] ss:$12 sps:$4 sm:$0xff]   ;;  %v116_v11 = vld [vmem:[#allocation7] sm:$0x3]  ;;  %v1633_v24 = vld [vmem:[#allocation11 + $0xa8] ss:$12 sps:$4 sm:$0xff]  }
  0x68   :  { %610 = vmatprep.subr.bf16.mxu1 %v1573_v29  ;;  %v1657_v7 = vld [vmem:[#allocation10 + $0x78] sm:$0xff]   ;;  %v1962_v10 = vsub.s32 0, %v1959_v9  ;;  %v1965_v12 = vsub.s32 1, %v1959_v9  ;;  %v1638_v27 = vld [vmem:[#allocation11 + $0x94] ss:$12 sps:$4 sm:$0xff]   ;;  %v268_v8 = vsub.s32 2, %v1959_v9 }
  0x69   :  { %v1658_v25 = vld [vmem:[#allocation10 + $0x38] sm:$0xff]   ;;  %v1662_v28 = vld [vmem:[#allocation10 + $0x70] sm:$0xff]  }
  0x6a   :  { %650 = vmatpush1.bf16.msra.mxu0 %v1569_v30  ;;  %v121_v13 = vrot.slane %v116_v11, %v1962_v10  ;;  %v125_v14 = vrot.slane %v116_v11, %v1965_v12  ;;  %v1636_v29 = vld [vmem:[#allocation11 + $0x90] ss:$12 sps:$4 sm:$0xff]   ;;  %v256_v11 = vld [vmem:[%s1995_s4] sm:$0xf] }
  0x6b   :  { %651 = vmatprep.subr.bf16.mxu0 %v1577_v31  ;;  %611 = vmatpush1.bf16.msra.mxu1 %v1578_v32  ;;  %v1663_v30 = vld [vmem:[#allocation10 + $0x30] sm:$0xff]   ;;  %v1641_v31 = vld [vmem:[#allocation11 + $0x7c] ss:$12 sps:$4 sm:$0xff]  }
  0x6c   :  { %612 = vmatprep.subr.bf16.mxu1 %v1579_v33  ;;  %v1667_v32 = vld [vmem:[#allocation10 + $0x68] sm:$0xff]   ;;  %v1639_v33 = vld [vmem:[#allocation11 + $0x78] ss:$12 sps:$4 sm:$0xff]  }
  0x6e   :  { %652 = vmatpush1.bf16.msra.mxu0 %v1575_v34  ;;  %v1668_v34 = vld [vmem:[#allocation10 + $0x28] sm:$0xff]  }
  0x6f   :  { %653 = vmatprep.subr.bf16.mxu0 %v1583_v35  ;;  %613 = vmatpush1.bf16.msra.mxu1 %v1584_v36  ;;  %v1644_v35 = vld [vmem:[#allocation11 + $0x64] ss:$12 sps:$4 sm:$0xff]  }
  0x70   :  { %614 = vmatprep.subr.bf16.mxu1 %v1585_v37  ;;  %v1672_v36 = vld [vmem:[#allocation10 + $0x60] sm:$0xff]  }
  0x71   :  { %v1642_v37 = vld [vmem:[#allocation11 + $0x60] ss:$12 sps:$4 sm:$0xff]  }
  0x72   :  { %654 = vmatpush1.bf16.msra.mxu0 %v1581_v38  ;;  %v1673_v38 = vld [vmem:[#allocation10 + $0x20] sm:$0xff]  }
  0x73   :  { %655 = vmatprep.subr.bf16.mxu0 %v1589_v39  ;;  %615 = vmatpush2.bf16.msra.mxu1 %v1590_v40  ;;  %v1647_v39 = vld [vmem:[#allocation11 + $0x4c] ss:$12 sps:$4 sm:$0xff]  }
  0x74   :  { %616 = vmatprep.subr.bf16.mxu1 %v1591_v41  ;;  %v1677_v40 = vld [vmem:[#allocation10 + $0x58] sm:$0xff]   ;;  %v1645_v41 = vld [vmem:[#allocation11 + $0x48] ss:$12 sps:$4 sm:$0xff]  }
  0x76   :  { %656 = vmatpush2.bf16.msra.mxu0 %v1587_v42  ;;  %v1678_v42 = vld [vmem:[#allocation10 + $0x18] sm:$0xff]  }
  0x77   :  { %657 = vmatprep.subr.bf16.mxu0 %v1595_v43  ;;  %617 = vmatpush2.bf16.msra.mxu1 %v1596_v45  ;;  %v1650_v43 = vld [vmem:[#allocation11 + $0x34] ss:$12 sps:$4 sm:$0xff]   ;;  %v1648_v45 = vld [vmem:[#allocation11 + $0x30] ss:$12 sps:$4 sm:$0xff]  }
  0x78   :  { %618 = vmatprep.subr.bf16.mxu1 %v1597_v46  ;;  %v1683_v46 = vld [vmem:[#allocation10 + $0x10] sm:$0xff]  }
  0x7a   :  { %658 = vmatpush2.bf16.msra.mxu0 %v1593_v44  ;;  %v1682_v44 = vld [vmem:[#allocation10 + $0x50] sm:$0xff]  }
  0x7b   :  { %659 = vmatprep.subr.bf16.mxu0 %v1601_v47  ;;  %619 = vmatpush2.bf16.msra.mxu1 %v1602_v48  ;;  %v1653_v47 = vld [vmem:[#allocation11 + $0x1c] ss:$12 sps:$4 sm:$0xff]   ;;  %v1651_v48 = vld [vmem:[#allocation11 + $0x18] ss:$12 sps:$4 sm:$0xff]  }
  0x7c   :  { %620 = vmatprep.subr.bf16.mxu1 %v1603_v49  ;;  %v1656_v49 = vld [vmem:[#allocation11 + $0x4] ss:$12 sps:$4 sm:$0xff]  }
  0x7e   :  { %660 = vmatpush2.bf16.msra.mxu0 %v1599_v50  ;;  %v1654_v50 = vld [vmem:[#allocation11] ss:$12 sps:$4 sm:$0xff]  }
  0x7f   :  { %661 = vmatprep.subr.bf16.mxu0 %v1607_v51  ;;  %621 = vmatpush2.bf16.msra.mxu1 %v1608_v52  ;;  %v1661_v51 = vld [vmem:[#allocation11 + $0x16c] ss:$12 sps:$4 sm:$0xff]   ;;  %v1659_v52 = vld [vmem:[#allocation11 + $0x168] ss:$12 sps:$4 sm:$0xff]  }
  0x80   :  { %622 = vmatprep.subr.bf16.mxu1 %v1609_v53  ;;  %v1666_v53 = vld [vmem:[#allocation11 + $0x154] ss:$12 sps:$4 sm:$0xff]  }
  0x82   :  { %662 = vmatpush2.bf16.msra.mxu0 %v1605_v54  ;;  %v1664_v54 = vld [vmem:[#allocation11 + $0x150] ss:$12 sps:$4 sm:$0xff]  }
  0x83   :  { %663 = vmatprep.subr.bf16.mxu0 %v1613_v55  ;;  %623 = vmatpush2.bf16.msra.mxu1 %v1614_v56  ;;  %v1671_v55 = vld [vmem:[#allocation11 + $0x13c] ss:$12 sps:$4 sm:$0xff]   ;;  %v1669_v56 = vld [vmem:[#allocation11 + $0x138] ss:$12 sps:$4 sm:$0xff]  }
  0x84   :  { %624 = vmatprep.subr.bf16.mxu1 %v1615_v57  ;;  %v1676_v57 = vld [vmem:[#allocation11 + $0x124] ss:$12 sps:$4 sm:$0xff]  }
  0x86   :  { %664 = vmatpush2.bf16.msra.mxu0 %v1611_v58  ;;  %v1674_v58 = vld [vmem:[#allocation11 + $0x120] ss:$12 sps:$4 sm:$0xff]  }
  0x87   :  { %665 = vmatprep.subr.bf16.mxu0 %v1619_v59  ;;  %625 = vmatpush2.bf16.msra.mxu1 %v1620_v60  ;;  %v1681_v59 = vld [vmem:[#allocation11 + $0x10c] ss:$12 sps:$4 sm:$0xff]   ;;  %v1679_v60 = vld [vmem:[#allocation11 + $0x108] ss:$12 sps:$4 sm:$0xff]  }
  0x88   :  { %626 = vmatprep.subr.bf16.mxu1 %v1621_v62  ;;  %v1684_v62 = vld [vmem:[#allocation11 + $0xf0] ss:$12 sps:$4 sm:$0xff]  }
  0x8a   :  { %666 = vmatpush2.bf16.msra.mxu0 %v1617_v61  ;;  %v1686_v61 = vld [vmem:[#allocation11 + $0xf4] ss:$12 sps:$4 sm:$0xff]  }
  0x8b   :  { %667 = vmatprep.subr.bf16.mxu0 %v1625_v63  ;;  %627 = vmatpush2.bf16.msra.mxu1 %v1626_v1  ;;  %v1687_v63 = vld [vmem:[#allocation10 + $0x48] sm:$0xff]  }
  0x8c   :  { %628 = vmatprep.subr.bf16.mxu1 %v1627_v2  ;;  %v1691_v1 = vld [vmem:[#allocation11 + $0xdc] ss:$12 sps:$4 sm:$0xff]   ;;  %v1689_v2 = vld [vmem:[#allocation11 + $0xd8] ss:$12 sps:$4 sm:$0xff]  }
  0x8e   :  { %668 = vmatpush2.bf16.msra.mxu0 %v1623_v0  ;;  %v1688_v0 = vld [vmem:[#allocation10 + $0x8] sm:$0xff]  }
  0x8f   :  { %669 = vmatprep.subr.bf16.mxu0 %v1631_v3  ;;  %629 = vmatpush2.bf16.msra.mxu1 %v1632_v5  ;;  %v1692_v3 = vld [vmem:[#allocation10 + $0x40] sm:$0xff]  }
  0x90   :  { %1474 = vmatprep.subr.bf16.mxu1 %v1657_v7  ;;  %v1696_v5 = vld [vmem:[#allocation11 + $0xc4] ss:$12 sps:$4 sm:$0xff]  }
  0x91   :  { %v1697_v7 = vld [vmem:[#allocation11 + $0x170] ss:$12 sps:$4 sm:$0xff]  }
  0x92   :  { %670 = vmatpush2.bf16.msra.mxu0 %v1629_v4  ;;  %v1693_v4 = vld [vmem:[#allocation10] sm:$0xff]  }
  0x93   :  { %1200 = vmatprep.subr.bf16.mxu0 %v1635_v6  ;;  %v1694_v6 = vld [vmem:[#allocation11 + $0xc0] ss:$12 sps:$4 sm:$0xff]  }
 0x115   :  { %v181_v15 = vpop.f32.mrf.mxu0 }
 0x116   :  { %v182_v16 = vadd.f32 %v181_v15, %v121_v13  ;;  %v272_v13 = vsub.s32 3, %v1959_v9  ;;  %v269_v15 = vrot.slane %v256_v11, %v268_v8 }
 0x117   :  { %v183_v17 = vpop.f32.mrf.mxu0 }
 0x118   :  { %v184_v18 = vadd.f32 %v183_v17, %v125_v14  ;;  %v188_v19 = vmax.f32 %v182_v16, 0.0  ;;  %v261_v14 = vrot.slane %v256_v11, %v1962_v10  ;;  %v265_v16 = vrot.slane %v256_v11, %v1965_v12 }
 0x119   :  { %v185_v20 = vpop.f32.mrf.mxu0  ;;  %v273_v17 = vrot.slane %v256_v11, %v272_v13 }
 0x11a   :  { %v189_v21 = vmax.f32 %v184_v18, 0.0  ;;  %v190_v26 = vpack.c.bf16 %v188_v19, %v188_v19 }
 0x11b   :  { %v186_v22 = vpop.f32.mrf.mxu0 }
 0x11c   :  { %v191_v23 = vpack.c.bf16 %v189_v21, %v189_v21 }
 0x11e   :  { %630 = vmatprep.mubr.bf16.mxu1 %v191_v23  ;;  %671 = vmatprep.mubr.bf16.mxu0 %v191_v23 }
 0x11f   :  { %631 = vmatmul.mubr.bf16.vlgmr.msra.gmra.mxu1 %v190_v26  ;;  %672 = vmatmul.mubr.bf16.vlgmr.msra.gmra.mxu0 %v190_v26 }
 0x120   :  { %1201 = vmatpush1.bf16.msra.mxu0 %v1633_v24  ;;  %1475 = vmatpush3.bf16.msra.mxu1 %v1658_v25 }
 0x121   :  { %1202 = vmatprep.subr.bf16.mxu0 %v1638_v27  ;;  %1476 = vmatprep.subr.bf16.mxu1 %v1662_v28 }
 0x124   :  { %1203 = vmatpush1.bf16.msra.mxu0 %v1636_v29  ;;  %1477 = vmatpush3.bf16.msra.mxu1 %v1663_v30 }
 0x125   :  { %1204 = vmatprep.subr.bf16.mxu0 %v1641_v31  ;;  %1478 = vmatprep.subr.bf16.mxu1 %v1667_v32 }
 0x128   :  { %1205 = vmatpush1.bf16.msra.mxu0 %v1639_v33  ;;  %1479 = vmatpush3.bf16.msra.mxu1 %v1668_v34 }
 0x129   :  { %1206 = vmatprep.subr.bf16.mxu0 %v1644_v35  ;;  %1480 = vmatprep.subr.bf16.mxu1 %v1672_v36  ;;  %v1698_v36 = vld [vmem:[#allocation11 + $0xb0] ss:$12 sps:$4 sm:$0xff]  }
 0x12c   :  { %1207 = vmatpush1.bf16.msra.mxu0 %v1642_v37  ;;  %1481 = vmatpush3.bf16.msra.mxu1 %v1673_v38 }
 0x12d   :  { %1208 = vmatprep.subr.bf16.mxu0 %v1647_v39  ;;  %1482 = vmatprep.subr.bf16.mxu1 %v1677_v40  ;;  %v1699_v39 = vld [vmem:[#allocation11 + $0x158] ss:$12 sps:$4 sm:$0xff]  }
 0x12e   :  { %v1700_v40 = vld [vmem:[#allocation11 + $0x98] ss:$12 sps:$4 sm:$0xff]  }
 0x130   :  { %1209 = vmatpush1.bf16.msra.mxu0 %v1645_v41  ;;  %1483 = vmatpush3.bf16.msra.mxu1 %v1678_v42  ;;  %v1701_v41 = vld [vmem:[#allocation11 + $0x140] ss:$12 sps:$4 sm:$0xff]  }
 0x131   :  { %1210 = vmatprep.subr.bf16.mxu0 %v1650_v43  ;;  %1484 = vmatprep.subr.bf16.mxu1 %v1682_v44  ;;  %v1702_v42 = vld [vmem:[#allocation11 + $0x80] ss:$12 sps:$4 sm:$0xff]   ;;  %v1703_v43 = vld [vmem:[#allocation11 + $0x128] ss:$12 sps:$4 sm:$0xff]  }
 0x132   :  { %v1704_v44 = vld [vmem:[#allocation11 + $0x68] ss:$12 sps:$4 sm:$0xff]  }
 0x134   :  { %1211 = vmatpush1.bf16.msra.mxu0 %v1648_v45  ;;  %1485 = vmatpush3.bf16.msra.mxu1 %v1683_v46  ;;  %v1705_v45 = vld [vmem:[#allocation11 + $0x110] ss:$12 sps:$4 sm:$0xff]  }
 0x135   :  { %1212 = vmatprep.subr.bf16.mxu0 %v1653_v47  ;;  %1486 = vmatprep.subr.bf16.mxu1 %v1687_v63  ;;  %v1706_v46 = vld [vmem:[#allocation11 + $0x50] ss:$12 sps:$4 sm:$0xff]   ;;  %v1707_v47 = vld [vmem:[#allocation11 + $0xf8] ss:$12 sps:$4 sm:$0xff]  }
 0x138   :  { %1213 = vmatpush1.bf16.msra.mxu0 %v1651_v48  ;;  %1487 = vmatpush3.bf16.msra.mxu1 %v1688_v0  ;;  %v1708_v48 = vld [vmem:[#allocation11 + $0x38] ss:$12 sps:$4 sm:$0xff]  }
 0x139   :  { %1214 = vmatprep.subr.bf16.mxu0 %v1656_v49  ;;  %1488 = vmatprep.subr.bf16.mxu1 %v1692_v3  ;;  %v1709_v49 = vld [vmem:[#allocation11 + $0xe0] ss:$12 sps:$4 sm:$0xff]  }
 0x13c   :  { %1215 = vmatpush1.bf16.msra.mxu0 %v1654_v50  ;;  %1489 = vmatpush3.bf16.msra.mxu1 %v1693_v4  ;;  %v1710_v50 = vld [vmem:[#allocation11 + $0x20] ss:$12 sps:$4 sm:$0xff]   ;;  %v1409_v4 = vld [vmem:[%s1997_s6] ss:$0 sm:$0xff]  ;;  %s1890_s6 = smov [#allocation13]  }
 0x13d   :  { %1216 = vmatprep.subr.bf16.mxu0 %v1661_v51  ;;  %1496 = vmatprep.subr.bf16.mxu1 %v1697_v7  ;;  %v1711_v51 = vld [vmem:[#allocation11 + $0xc8] ss:$12 sps:$4 sm:$0xff]  }
 0x140   :  { %1217 = vmatpush2.bf16.msra.mxu0 %v1659_v52  ;;  %v1712_v52 = vld [vmem:[#allocation11 + $0x8] ss:$12 sps:$4 sm:$0xff]  }
 0x141   :  { %1218 = vmatprep.subr.bf16.mxu0 %v1666_v53 }
 0x144   :  { %1219 = vmatpush2.bf16.msra.mxu0 %v1664_v54 }
 0x145   :  { %1220 = vmatprep.subr.bf16.mxu0 %v1671_v55 }
 0x148   :  { %1221 = vmatpush2.bf16.msra.mxu0 %v1669_v56 }
 0x149   :  { %1222 = vmatprep.subr.bf16.mxu0 %v1676_v57 }
 0x14c   :  { %1223 = vmatpush2.bf16.msra.mxu0 %v1674_v58 }
 0x14d   :  { %1224 = vmatprep.subr.bf16.mxu0 %v1681_v59 }
 0x150   :  { %1225 = vmatpush2.bf16.msra.mxu0 %v1679_v60 }
 0x151   :  { %1226 = vmatprep.subr.bf16.mxu0 %v1686_v61  ;;  %v927_v61 = vld [vmem:[%s1999_s8] sm:$0x7]  ;;  %s1329_s8 = sshll.u32 %s1890_s6, 4  ;;  %s1330_s8 = int_to_ptr.vmem [resolvable:$true] %s1329_s8 }
 0x152   :  { %v932_v63 = vrot.slane %v927_v61, %v1962_v10  ;;  %v940_v3 = vrot.slane %v927_v61, %v268_v8  ;;  %s1845_s25 = scalar_lea.vmem %s1330_s8, 384  ;;  %p1850_p3 = scmp.lt.s32.totalorder %s1330_s8, %s1330_s8 }
 0x153   :  { %p1846_p2 = scmp.ne.s32.totalorder %s1330_s8, %s1845_s25  ;;  %p1851_p4 = scmp.lt.s32.totalorder %s1845_s25, %s1845_s25 }
 0x154   :  { %1227 = vmatpush2.bf16.msra.mxu0 %v1684_v62  ;;  %v936_v62 = vrot.slane %v927_v61, %v1965_v12 }
 0x155   :  { %1228 = vmatprep.subr.bf16.mxu0 %v1691_v1  ;;  %p1852_p5 = por %p1851_p4, %p1850_p3 }
 0x157   :  { %p1853_p6 = pnand %p1852_p5, %p1846_p2 }
 0x158   :  { %1229 = vmatpush2.bf16.msra.mxu0 %v1689_v2 }
 0x159   :  { %1230 = vmatprep.subr.bf16.mxu0 %v1696_v5 }
 0x15c   :  { %1231 = vmatpush2.bf16.msra.mxu0 %v1694_v6 }
 0x1df   :  { %v632_v18 = vpop.f32.mrf.mxu1  ;;  %v673_v19 = vpop.f32.mrf.mxu0 }
 0x1e0   :  { %v633_v20 = vadd.f32 %v632_v18, %v261_v14  ;;  %v674_v21 = vadd.f32 %v673_v19, %v269_v15 }
 0x1e1   :  { %v634_v22 = vpop.f32.mrf.mxu1  ;;  %v675_v23 = vpop.f32.mrf.mxu0 }
 0x1e2   :  { %v635_v24 = vadd.f32 %v634_v22, %v265_v16  ;;  %v676_v25 = vadd.f32 %v675_v23, %v273_v17  ;;  %v680_v26 = vmax.f32 %v633_v20, 0.0  ;;  %v682_v27 = vmax.f32 %v674_v21, 0.0 }
 0x1e3   :  { %v636_v28 = vpop.f32.mrf.mxu1  ;;  %v677_v29 = vpop.f32.mrf.mxu0 }
 0x1e4   :  { %v681_v30 = vmax.f32 %v635_v24, 0.0  ;;  %v683_v31 = vmax.f32 %v676_v25, 0.0  ;;  %v684_v37 = vpack.c.bf16 %v680_v26, %v680_v26  ;;  %v861_v38 = vpack.c.bf16 %v682_v27, %v682_v27 }
 0x1e5   :  { %v637_v32 = vpop.f32.mrf.mxu1  ;;  %v678_v33 = vpop.f32.mrf.mxu0 }
 0x1e6   :  { %v685_v34 = vpack.c.bf16 %v681_v30, %v681_v30  ;;  %v862_v35 = vpack.c.bf16 %v683_v31, %v683_v31 }
 0x1e8   :  { %853 = vmatprep.mubr.bf16.mxu1 %v685_v34  ;;  %1232 = vmatprep.mubr.bf16.mxu0 %v862_v35 }
 0x1e9   :  { %854 = vmatmul.mubr.bf16.vlgmr.msra.gmra.mxu1 %v684_v37  ;;  %1233 = vmatmul.mubr.bf16.vlgmr.msra.gmra.mxu0 %v861_v38 }
 0x1ea   :  { %1497 = vmatpush3.bf16.msra.mxu1 %v1698_v36  ;;  %1273 = vmatprep.mubr.bf16.mxu1 %v862_v35 }
 0x1eb   :  { %1498 = vmatprep.subr.bf16.mxu1 %v1699_v39 }
 0x1ee   :  { %1499 = vmatpush3.bf16.msra.mxu1 %v1700_v40 }
 0x1ef   :  { %1500 = vmatprep.subr.bf16.mxu1 %v1701_v41 }
 0x1f2   :  { %1501 = vmatpush3.bf16.msra.mxu1 %v1702_v42 }
 0x1f3   :  { %1502 = vmatprep.subr.bf16.mxu1 %v1703_v43 }
 0x1f6   :  { %1503 = vmatpush3.bf16.msra.mxu1 %v1704_v44 }
 0x1f7   :  { %1504 = vmatprep.subr.bf16.mxu1 %v1705_v45 }
 0x1fa   :  { %1505 = vmatpush3.bf16.msra.mxu1 %v1706_v46 }
 0x1fb   :  { %1506 = vmatprep.subr.bf16.mxu1 %v1707_v47 }
 0x1fe   :  { %1507 = vmatpush3.bf16.msra.mxu1 %v1708_v48 }
 0x1ff   :  { %1508 = vmatprep.subr.bf16.mxu1 %v1709_v49 }
 0x202   :  { %1509 = vmatpush3.bf16.msra.mxu1 %v1710_v50 }
 0x203   :  { %1510 = vmatprep.subr.bf16.mxu1 %v1711_v51 }
 0x206   :  { %1511 = vmatpush3.bf16.msra.mxu1 %v1712_v52 }
 0x209   :  { %1274 = vmatmul.mubr.bf16.vlgmr.msra.gmra.mxu1 %v861_v38 }
 0x2a9   :  { %v1490_v53 = vpop.f32.mrf.mxu1  ;;  %v1234_v54 = vpop.f32.mrf.mxu0 }
 0x2aa   :  { %v1235_v6 = vadd.f32 %v1234_v54, %v932_v63 }
 0x2ab   :  { %v1491_v55 = vpop.f32.mrf.mxu1  ;;  %v1236_v56 = vpop.f32.mrf.mxu0 }
 0x2ac   :  { %v1492_v1 = vadd.f32 %v1491_v55, %v1490_v53  ;;  %v1237_v2 = vadd.f32 %v1236_v56, %v936_v62 }
 0x2ad   :  { %v1493_v57 = vpop.f32.mrf.mxu1  ;;  %v1238_v58 = vpop.f32.mrf.mxu0 }
 0x2ae   :  { %v856_v13 = vadd.f32 %v1492_v1, %v1409_v4  ;;  %v1281_v14 = vadd.f32 %v1237_v2, %v1235_v6 }
 0x2af   :  { %v1494_v59 = vpop.f32.mrf.mxu1  ;;  %v1239_v60 = vpop.f32.mrf.mxu0 }
 0x2b0   :  { %v1284_v18 = vadd.f32 %v1235_v6, %v856_v13  ;;  %v1297_v9 = vadd.f32 %v1237_v2, %v856_v13 }
 0x2c9   :  { %v1512_v0 = vpop.f32.mrf.mxu1 }
 0x2cb   :  { %v1513_v5 = vpop.f32.mrf.mxu1 }
 0x2cc   :  { %v1514_v7 = vadd.f32 %v1513_v5, %v1512_v0 }
 0x2cd   :  { %v1515_v11 = vpop.f32.mrf.mxu1 }
 0x2ce   :  { %v1276_v15 = vadd.f32 %v1514_v7, %v940_v3 }
 0x2cf   :  { %v1516_v12 = vpop.f32.mrf.mxu1 }
 0x2d0   :  { %v1282_v16 = vadd.f32 %v1281_v14, %v1276_v15  ;;  %v1310_v17 = vadd.f32 %v1276_v15, %v856_v13 }
 0x2d2   :  { %v1283_v10 = vmul.f32 0.33333334, %v1282_v16 }
 0x2d4   :  { %v1311_v19 = vsub.f32 %v1310_v17, %v1283_v10  ;;  %v1285_v20 = vsub.f32 %v1284_v18, %v1283_v10  ;;  %v1298_v8 = vsub.f32 %v1297_v9, %v1283_v10 }
 0x2d6   :  { %1312 = vmax.xlane.f32.xlu1 %v1311_v19  ;;  %1286 = vmax.xlane.f32.xlu0 %v1285_v20 }
 0x2da   :  { %1299 = vmax.xlane.f32.xlu0 %v1298_v8 }
 0x35f   :  { %v1313_v21 = vpop.xlane.xlu1 %1312  ;;  %v1287_v22 = vpop.xlane.xlu0 %1286 }
 0x360   :  { %v1288_v23 = vsub.f32 %v1285_v20, %v1287_v22  ;;  %v1314_v24 = vsub.f32 %v1311_v19, %v1313_v21 }
 0x362   :  { %v1289_v25 = vmul.f32 1.442695, %v1288_v23  ;;  %v1315_v28 = vmul.f32 1.442695, %v1314_v24 }
 0x363   :  { %v1300_v26 = vpop.xlane.xlu0 %1299 }
 0x364   :  { %v1301_v27 = vsub.f32 %v1298_v8, %v1300_v26  ;;  %1713 = vpow2.f32 %v1289_v25 }
 0x366   :  { %v1302_v29 = vmul.f32 1.442695, %v1301_v27 }
 0x368   :  { %1715 = vpow2.f32 %v1302_v29 }
 0x369   :  { %1717 = vpow2.f32 %v1315_v28 }
 0x371   :  { %v1714_v30 = vpop.eup %1713 }
 0x372   :  { %1291 = vadd.xlane.f32.xlu1 %v1714_v30 }
 0x375   :  { %v1716_v31 = vpop.eup %1715 }
 0x376   :  { %v1718_v32 = vpop.eup %1717  ;;  %1304 = vadd.xlane.f32.xlu0 %v1716_v31 }
 0x377   :  { %1317 = vadd.xlane.f32.xlu1 %v1718_v32 }
 0x3fb   :  { %v1292_v33 = vpop.xlane.xlu1 %1291 }
 0x3fc   :  { %1719 = vrcp.f32 %v1292_v33 }
 0x3ff   :  { %v1305_v34 = vpop.xlane.xlu0 %1304 }
 0x400   :  { %v1318_v35 = vpop.xlane.xlu1 %1317  ;;  %1721 = vrcp.f32 %v1305_v34 }
 0x401   :  { %1723 = vrcp.f32 %v1318_v35 }
 0x409   :  { %v1720_v36 = vpop.eup %1719 }
 0x40a   :  { %v1294_v37 = vmul.f32 %v1720_v36, %v1714_v30 }
 0x40c   :  { %v1295_v39 = vmax.f32 %v1294_v37, 1e-08 }
 0x40d   :  { %v1722_v38 = vpop.eup %1721 }
 0x40e   :  { %v1724_v40 = vpop.eup %1723  ;;  %v1307_v41 = vmul.f32 %v1722_v38, %v1716_v31  ;;  %1296 = vst [vmem:[#allocation13] sm:$0xff] %v1295_v39 }
 0x40f   :  { %v1320_v42 = vmul.f32 %v1724_v40, %v1718_v32 }
 0x410   :  { %v1308_v43 = vmax.f32 %v1307_v41, 1e-08 }
 0x411   :  { %v1321_v44 = vmax.f32 %v1320_v42, 1e-08 }
 0x412   :  { %1309 = vst [vmem:[#allocation13 + $0x8] sm:$0xff] %v1308_v43 }
 0x413   :  { %1322 = vst [vmem:[#allocation13 + $0x10] sm:$0xff] %v1321_v44 }
 0x414   :  { %1856 = shalt.err (!%p1853_p6)
}
 0x415   :  { %1332 = dma.vmem_to_hbm [thread:$0]  %s1330_s8, 384, %s2000_s9, [#allocation4]  }
 0x416   :  { %1873 = dma.done.wait [#allocation4], 384  }
 0x417   :  { %1874 = vsyncadd [#allocation4], 4294966912 }
 0x418   :  { %1336 = vsyncpa [#allocation3], 1 }
 0x419   :  { %1337 = vsyncpa [#allocation6], 1 }
 0x41a   :  { %1338 = vsyncpa [#allocation9], 1 }
 0x41b   :  { %1339 = vsyncpa [#allocation12], 1 }
 0x41c   :  { %1340 = vsyncpa [#allocation4], 1 }

</bundles_post_ra>
